<compile_context>
chip_gen: v6e
topology: v6e:2x2x1
jax: 0.10.0
libtpu: 0.0.40
codegen_flags: <defaults>
</compile_context>

<pallas_src>
import jax
import jax.numpy as jnp
from jax.experimental import pallas as pl
from jax.experimental.pallas import tpu as pltpu

HIDDEN = 256
MAX_TB = 512   # upper bound on the batch tile


def _critic_kernel(s_ref, a_ref,
                   w14_ref, b14_ref,
                   w2_ref, b2_ref, w5_ref, b5_ref,
                   w3_ref, b3_ref, w6_ref, b6_ref,
                   q1_ref, q2_ref,
                   sa_ref):
    ds = s_ref.shape[1]

    # Assemble [state | action] in VMEM (cheap masked VPU stores; no HBM concat),
    # then run ONE fused first-layer matmul for both Q-heads (bf16 operands,
    # f32 accumulation, f32 bias + ReLU).
    sa_ref[:, :ds] = s_ref[...]
    sa_ref[:, ds:] = a_ref[...]
    sa = sa_ref[...].astype(jnp.bfloat16)

    hg = jnp.dot(sa, w14_ref[...], preferred_element_type=jnp.float32)
    hg = jnp.maximum(hg + b14_ref[...], 0.0)
    h = hg[:, :HIDDEN].astype(jnp.bfloat16)   # Q1 branch (vreg-aligned split)
    g = hg[:, HIDDEN:].astype(jnp.bfloat16)   # Q2 branch

    # Second layers: two separate 256x256 bf16 matmuls (map 1:1 onto the MXU
    # tile), f32 accumulate, f32 bias + ReLU.
    h = jnp.maximum(
        jnp.dot(h, w2_ref[...], preferred_element_type=jnp.float32) + b2_ref[...], 0.0)
    g = jnp.maximum(
        jnp.dot(g, w5_ref[...], preferred_element_type=jnp.float32) + b5_ref[...], 0.0)

    # Output layers on VPU + XLU (full f32): elementwise multiply by the f32
    # weight row, lane-reduce, add scalar bias.  No MXU, no zero-padded columns.
    q1_ref[...] = jnp.sum(h * w3_ref[...], axis=-1, keepdims=True) + b3_ref[...]
    q2_ref[...] = jnp.sum(g * w6_ref[...], axis=-1, keepdims=True) + b6_ref[...]


def _round_up(x, m):
    return ((x + m - 1) // m) * m


def _batch_tiling(b):
    """Returns (tile_rows, padded_batch, grid_steps)."""
    if b <= 256:
        # Single block whose batch dim equals the real batch: no wrapper pad,
        # no output slice; Mosaic masks the partial sublane tile internally.
        return b, b, 1
    b16 = _round_up(b, 16)
    # >= 2 grid steps so v7x's two TensorCores both get work, balanced tiles
    # so padding stays small (B=520 -> 2 x 272, not 2 x 512).
    n = max(-(-b16 // MAX_TB), 2)
    tb = _round_up(-(-b16 // n), 16)
    return tb, tb * n, n


@jax.jit
def critic_forward(state, action, packed):
    """Returns (q1, q2), matching Critic.forward(state, action)."""
    b, ds = state.shape
    da = action.shape[1]
    tb, b_pad, grid = _batch_tiling(b)

    if b_pad != b:
        state = jnp.pad(state, ((0, b_pad - b), (0, 0)))
        action = jnp.pad(action, ((0, b_pad - b), (0, 0)))

    def batch_spec(cols):
        return pl.BlockSpec((tb, cols), lambda i: (i, 0))

    def full_spec(arr):
        return pl.BlockSpec(arr.shape, lambda i: (0, 0))

    in_specs = [batch_spec(ds), batch_spec(da)] + [full_spec(a) for a in packed]
    out_spec = pl.BlockSpec((tb, 1), lambda i: (i, 0))

    q1, q2 = pl.pallas_call(
        _critic_kernel,
        out_shape=(jax.ShapeDtypeStruct((b_pad, 1), jnp.float32),
                   jax.ShapeDtypeStruct((b_pad, 1), jnp.float32)),
        grid=(grid,),
        in_specs=in_specs,
        out_specs=(out_spec, out_spec),
        scratch_shapes=[pltpu.VMEM((tb, ds + da), jnp.float32)],
        compiler_params=pltpu.CompilerParams(
            dimension_semantics=("parallel",)),
    )(state, action, *packed)

    if b_pad != b:
        # Padded rows carry relu(bias)-propagated garbage; drop them.
        q1, q2 = q1[:b], q2[:b]
    return q1, q2


def init_critic_params(key, state_dim, action_dim):
    """Deterministic synthetic init (PyTorch-Linear-like uniform fan-in).

    Canonical params: f32 weights [in, out] and biases [1, out] for l1..l6.
    """
    sa_dim = state_dim + action_dim
    dims = [(sa_dim, HIDDEN), (HIDDEN, HIDDEN), (HIDDEN, 1),
            (sa_dim, HIDDEN), (HIDDEN, HIDDEN), (HIDDEN, 1)]
    params = []
    for i, (fan_in, fan_out) in enumerate(dims):
        kw, kb = jax.random.split(jax.random.fold_in(key, i))
        bound = 1.0 / jnp.sqrt(jnp.float32(fan_in))
        w = jax.random.uniform(kw, (fan_in, fan_out), jnp.float32, -bound, bound)
        bias = jax.random.uniform(kb, (1, fan_out), jnp.float32, -bound, bound)
        params += [w, bias]
    return tuple(params)


def pack_critic_params(params):
    """Repack canonical params into the fused / mixed-precision kernel layout."""
    (w1, b1, w2, b2, w3, b3, w4, b4, w5, b5, w6, b6) = params
    bf = jnp.bfloat16

    w14 = jnp.concatenate([w1, w4], axis=1).astype(bf)   # [sa_dim, 512] bf16
    b14 = jnp.concatenate([b1, b4], axis=1)              # [1, 512] f32

    return (w14, b14,
            w2.astype(bf), b2,                            # [256,256] bf16, [1,256] f32
            w5.astype(bf), b5,
            w3.T, b3,                                     # [1,256] f32, [1,1] f32
            w6.T, b6)


def critic_reference(state, action, params):
    """Plain-JAX f32 reference (semantics of the PyTorch module)."""
    (w1, b1, w2, b2, w3, b3, w4, b4, w5, b5, w6, b6) = params
    sa = jnp.concatenate([state, action], axis=1)
    h = jnp.maximum(sa @ w1 + b1, 0.0)
    h = jnp.maximum(h @ w2 + b2, 0.0)
    q1 = h @ w3 + b3
    g = jnp.maximum(sa @ w4 + b4, 0.0)
    g = jnp.maximum(g @ w5 + b5, 0.0)
    q2 = g @ w6 + b6
    return q1, q2


def critic_reference_mixed(state, action, params):
    """Plain-JAX reference following the kernel's exact precision path."""
    (w1, b1, w2, b2, w3, b3, w4, b4, w5, b5, w6, b6) = params
    bf = jnp.bfloat16
    sa = jnp.concatenate([state, action], axis=1).astype(bf)
    h = jnp.maximum(jnp.dot(sa, w1.astype(bf),
                            preferred_element_type=jnp.float32) + b1, 0.0)
    g = jnp.maximum(jnp.dot(sa, w4.astype(bf),
                            preferred_element_type=jnp.float32) + b4, 0.0)
    h = jnp.maximum(jnp.dot(h.astype(bf), w2.astype(bf),
                            preferred_element_type=jnp.float32) + b2, 0.0)
    g = jnp.maximum(jnp.dot(g.astype(bf), w5.astype(bf),
                            preferred_element_type=jnp.float32) + b5, 0.0)
    q1 = jnp.sum(h * w3[:, 0], axis=-1, keepdims=True) + b3
    q2 = jnp.sum(g * w6[:, 0], axis=-1, keepdims=True) + b6
    return q1, q2


if __name__ == "__main__":
    key = jax.random.PRNGKey(0)
    k_s, k_a, k_p, k_s2, k_a2 = jax.random.split(key, 5)

    state_dim, action_dim = 16, 4
    params = init_critic_params(k_p, state_dim, action_dim)
    packed = pack_critic_params(params)

    # Small RL-style batch: single-block fast path (no pad, no slice).
    batch = 2
    state = jax.random.normal(k_s, (batch, state_dim), jnp.float32)
    action = jax.random.normal(k_a, (batch, action_dim), jnp.float32)

    q1, q2 = critic_forward(state, action, packed)
    jax.block_until_ready((q1, q2))

    q1_m, q2_m = critic_reference_mixed(state, action, params)
    q1_f, q2_f = critic_reference(state, action, params)

    assert q1.shape == (batch, 1) and q2.shape == (batch, 1)
    # Tight check vs. a reference that follows the same bf16/f32 mixed path.
    assert jnp.allclose(q1, q1_m, atol=2e-2, rtol=2e-2)
    assert jnp.allclose(q2, q2_m, atol=2e-2, rtol=2e-2)
    # Loose check vs. full-f32 math (bf16 weights lose ~3 decimal digits).
    assert jnp.allclose(q1, q1_f, atol=2e-1, rtol=2e-1)
    assert jnp.allclose(q2, q2_f, atol=2e-1, rtol=2e-1)

    # Larger batch: exercises the balanced multi-tile (>=2 grid steps) path.
    batch2 = 300
    state2 = jax.random.normal(k_s2, (batch2, state_dim), jnp.float32)
    action2 = jax.random.normal(k_a2, (batch2, action_dim), jnp.float32)
    q1b, q2b = critic_forward(state2, action2, packed)
    jax.block_until_ready((q1b, q2b))
    q1b_m, q2b_m = critic_reference_mixed(state2, action2, params)
    assert q1b.shape == (batch2, 1) and q2b.shape == (batch2, 1)
    assert jnp.allclose(q1b, q1b_m, atol=2e-2, rtol=2e-2)
    assert jnp.allclose(q2b, q2b_m, atol=2e-2, rtol=2e-2)

    print("KERNEL_OK")
</pallas_src>

<mosaic_0001>
module attributes {stable_mosaic.version = 11 : i64} {
  func.func @_critic_kernel(%arg0: i32, %arg1: memref<2x16xf32, #tpu.memory_space<vmem>>, %arg2: memref<2x4xf32, #tpu.memory_space<vmem>>, %arg3: memref<20x512xbf16, #tpu.memory_space<vmem>>, %arg4: memref<1x512xf32, #tpu.memory_space<vmem>>, %arg5: memref<256x256xbf16, #tpu.memory_space<vmem>>, %arg6: memref<1x256xf32, #tpu.memory_space<vmem>>, %arg7: memref<256x256xbf16, #tpu.memory_space<vmem>>, %arg8: memref<1x256xf32, #tpu.memory_space<vmem>>, %arg9: memref<1x256xf32, #tpu.memory_space<vmem>>, %arg10: memref<1x1xf32, #tpu.memory_space<vmem>>, %arg11: memref<1x256xf32, #tpu.memory_space<vmem>>, %arg12: memref<1x1xf32, #tpu.memory_space<vmem>>, %arg13: memref<2x1xf32, #tpu.memory_space<vmem>>, %arg14: memref<2x1xf32, #tpu.memory_space<vmem>>, %arg15: memref<2x20xf32, #tpu.memory_space<vmem>>) attributes {dimension_semantics = [#tpu.dimension_semantics<parallel>], iteration_bounds = array<i64: 1>, scalar_prefetch = 0 : i64, scratch_operands = 1 : i64, tpu.core_type = #tpu.core_type<tc>, window_params = [{transform_indices = @transform_0, window_bounds = array<i64: 2, 16>}, {transform_indices = @transform_1, window_bounds = array<i64: 2, 4>}, {pipeline_mode = #tpu.pipeline_mode<synchronous>, transform_indices = @transform_2, window_bounds = array<i64: 20, 512>}, {pipeline_mode = #tpu.pipeline_mode<synchronous>, transform_indices = @transform_3, window_bounds = array<i64: 1, 512>}, {pipeline_mode = #tpu.pipeline_mode<synchronous>, transform_indices = @transform_4, window_bounds = array<i64: 256, 256>}, {pipeline_mode = #tpu.pipeline_mode<synchronous>, transform_indices = @transform_5, window_bounds = array<i64: 1, 256>}, {pipeline_mode = #tpu.pipeline_mode<synchronous>, transform_indices = @transform_6, window_bounds = array<i64: 256, 256>}, {pipeline_mode = #tpu.pipeline_mode<synchronous>, transform_indices = @transform_7, window_bounds = array<i64: 1, 256>}, {pipeline_mode = #tpu.pipeline_mode<synchronous>, transform_indices = @transform_8, window_bounds = array<i64: 1, 256>}, {pipeline_mode = #tpu.pipeline_mode<synchronous>, transform_indices = @transform_9, window_bounds = array<i64: 1, 1>}, {pipeline_mode = #tpu.pipeline_mode<synchronous>, transform_indices = @transform_10, window_bounds = array<i64: 1, 256>}, {pipeline_mode = #tpu.pipeline_mode<synchronous>, transform_indices = @transform_11, window_bounds = array<i64: 1, 1>}, {transform_indices = @transform_12, window_bounds = array<i64: 2, 1>}, {transform_indices = @transform_13, window_bounds = array<i64: 2, 1>}]} {
    %c0 = arith.constant 0 : index
    %c0_0 = arith.constant 0 : index
    %0 = vector.load %arg1[%c0, %c0_0] : memref<2x16xf32, #tpu.memory_space<vmem>>, vector<2x16xf32>
    %c0_1 = arith.constant 0 : index
    %c0_2 = arith.constant 0 : index
    %1 = vector.load %arg15[%c0_1, %c0_2] : memref<2x20xf32, #tpu.memory_space<vmem>>, vector<2x16xf32>
    tpu.vector_store %arg15[%c0_1, %c0_2], %0 {strides = array<i32>} : memref<2x20xf32, #tpu.memory_space<vmem>>, vector<2x16xf32>,
    %c0_3 = arith.constant 0 : index
    %c0_4 = arith.constant 0 : index
    %2 = vector.load %arg2[%c0_3, %c0_4] : memref<2x4xf32, #tpu.memory_space<vmem>>, vector<2x4xf32>
    %c0_5 = arith.constant 0 : index
    %c16 = arith.constant 16 : index
    %3 = vector.load %arg15[%c0_5, %c16] : memref<2x20xf32, #tpu.memory_space<vmem>>, vector<2x4xf32>
    tpu.vector_store %arg15[%c0_5, %c16], %2 {strides = array<i32>} : memref<2x20xf32, #tpu.memory_space<vmem>>, vector<2x4xf32>,
    %c0_6 = arith.constant 0 : index
    %c0_7 = arith.constant 0 : index
    %4 = vector.load %arg15[%c0_6, %c0_7] : memref<2x20xf32, #tpu.memory_space<vmem>>, vector<2x20xf32>
    %5 = arith.truncf %4 : vector<2x20xf32> to vector<2x20xbf16>
    %c0_8 = arith.constant 0 : index
    %c0_9 = arith.constant 0 : index
    %6 = vector.load %arg3[%c0_8, %c0_9] : memref<20x512xbf16, #tpu.memory_space<vmem>>, vector<20x512xbf16>
    %cst = arith.constant dense<0.000000e+00> : vector<2x512xf32>
    %7 = tpu.matmul %5, %6, %cst {dimension_numbers = #tpu.dot_dimension_numbers<[1], [0], [0], [1], [0, 0, 1, 1], [], []>} : vector<2x20xbf16>, vector<20x512xbf16>, vector<2x512xf32> -> vector<2x512xf32>
    %c0_10 = arith.constant 0 : index
    %c0_11 = arith.constant 0 : index
    %8 = vector.load %arg4[%c0_10, %c0_11] : memref<1x512xf32, #tpu.memory_space<vmem>>, vector<1x512xf32>
    %9 = vector.broadcast %8 : vector<1x512xf32> to vector<2x512xf32>
    %10 = arith.addf %7, %9 : vector<2x512xf32>
    %cst_12 = arith.constant 0.000000e+00 : f32
    %11 = vector.broadcast %cst_12 : f32 to vector<2x512xf32>
    %12 = arith.maximumf %10, %11 : vector<2x512xf32>
    %13 = vector.extract_strided_slice %12 {offsets = [0, 0], sizes = [2, 256], strides = [1, 1]} : vector<2x512xf32> to vector<2x256xf32>
    %14 = arith.truncf %13 : vector<2x256xf32> to vector<2x256xbf16>
    %15 = vector.extract_strided_slice %12 {offsets = [0, 256], sizes = [2, 256], strides = [1, 1]} : vector<2x512xf32> to vector<2x256xf32>
    %16 = arith.truncf %15 : vector<2x256xf32> to vector<2x256xbf16>
    %c0_13 = arith.constant 0 : index
    %c0_14 = arith.constant 0 : index
    %17 = vector.load %arg5[%c0_13, %c0_14] : memref<256x256xbf16, #tpu.memory_space<vmem>>, vector<256x256xbf16>
    %cst_15 = arith.constant dense<0.000000e+00> : vector<2x256xf32>
    %18 = tpu.matmul %14, %17, %cst_15 {dimension_numbers = #tpu.dot_dimension_numbers<[1], [0], [0], [1], [0, 0, 1, 1], [], []>} : vector<2x256xbf16>, vector<256x256xbf16>, vector<2x256xf32> -> vector<2x256xf32>
    %c0_16 = arith.constant 0 : index
    %c0_17 = arith.constant 0 : index
    %19 = vector.load %arg6[%c0_16, %c0_17] : memref<1x256xf32, #tpu.memory_space<vmem>>, vector<1x256xf32>
    %20 = vector.broadcast %19 : vector<1x256xf32> to vector<2x256xf32>
    %21 = arith.addf %18, %20 : vector<2x256xf32>
    %cst_18 = arith.constant 0.000000e+00 : f32
    %22 = vector.broadcast %cst_18 : f32 to vector<2x256xf32>
    %23 = arith.maximumf %21, %22 : vector<2x256xf32>
    %c0_19 = arith.constant 0 : index
    %c0_20 = arith.constant 0 : index
    %24 = vector.load %arg7[%c0_19, %c0_20] : memref<256x256xbf16, #tpu.memory_space<vmem>>, vector<256x256xbf16>
    %cst_21 = arith.constant dense<0.000000e+00> : vector<2x256xf32>
    %25 = tpu.matmul %16, %24, %cst_21 {dimension_numbers = #tpu.dot_dimension_numbers<[1], [0], [0], [1], [0, 0, 1, 1], [], []>} : vector<2x256xbf16>, vector<256x256xbf16>, vector<2x256xf32> -> vector<2x256xf32>
    %c0_22 = arith.constant 0 : index
    %c0_23 = arith.constant 0 : index
    %26 = vector.load %arg8[%c0_22, %c0_23] : memref<1x256xf32, #tpu.memory_space<vmem>>, vector<1x256xf32>
    %27 = vector.broadcast %26 : vector<1x256xf32> to vector<2x256xf32>
    %28 = arith.addf %25, %27 : vector<2x256xf32>
    %cst_24 = arith.constant 0.000000e+00 : f32
    %29 = vector.broadcast %cst_24 : f32 to vector<2x256xf32>
    %30 = arith.maximumf %28, %29 : vector<2x256xf32>
    %c0_25 = arith.constant 0 : index
    %c0_26 = arith.constant 0 : index
    %31 = vector.load %arg9[%c0_25, %c0_26] : memref<1x256xf32, #tpu.memory_space<vmem>>, vector<1x256xf32>
    %32 = vector.broadcast %31 : vector<1x256xf32> to vector<2x256xf32>
    %33 = arith.mulf %23, %32 : vector<2x256xf32>
    %cst_27 = arith.constant dense<0.000000e+00> : vector<2xf32>
    %34 = vector.multi_reduction <add>, %33, %cst_27 [1] : vector<2x256xf32> to vector<2xf32>
    %35 = vector.shape_cast %34 : vector<2xf32> to vector<2x1xf32>
    %c0_28 = arith.constant 0 : index
    %c0_29 = arith.constant 0 : index
    %36 = vector.load %arg10[%c0_28, %c0_29] : memref<1x1xf32, #tpu.memory_space<vmem>>, vector<1x1xf32>
    %37 = vector.broadcast %36 : vector<1x1xf32> to vector<2x1xf32>
    %38 = arith.addf %35, %37 : vector<2x1xf32>
    %c0_30 = arith.constant 0 : index
    %c0_31 = arith.constant 0 : index
    %39 = vector.load %arg13[%c0_30, %c0_31] : memref<2x1xf32, #tpu.memory_space<vmem>>, vector<2x1xf32>
    tpu.vector_store %arg13[%c0_30, %c0_31], %38 {strides = array<i32>} : memref<2x1xf32, #tpu.memory_space<vmem>>, vector<2x1xf32>,
    %c0_32 = arith.constant 0 : index
    %c0_33 = arith.constant 0 : index
    %40 = vector.load %arg11[%c0_32, %c0_33] : memref<1x256xf32, #tpu.memory_space<vmem>>, vector<1x256xf32>
    %41 = vector.broadcast %40 : vector<1x256xf32> to vector<2x256xf32>
    %42 = arith.mulf %30, %41 : vector<2x256xf32>
    %cst_34 = arith.constant dense<0.000000e+00> : vector<2xf32>
    %43 = vector.multi_reduction <add>, %42, %cst_34 [1] : vector<2x256xf32> to vector<2xf32>
    %44 = vector.shape_cast %43 : vector<2xf32> to vector<2x1xf32>
    %c0_35 = arith.constant 0 : index
    %c0_36 = arith.constant 0 : index
    %45 = vector.load %arg12[%c0_35, %c0_36] : memref<1x1xf32, #tpu.memory_space<vmem>>, vector<1x1xf32>
    %46 = vector.broadcast %45 : vector<1x1xf32> to vector<2x1xf32>
    %47 = arith.addf %44, %46 : vector<2x1xf32>
    %c0_37 = arith.constant 0 : index
    %c0_38 = arith.constant 0 : index
    %48 = vector.load %arg14[%c0_37, %c0_38] : memref<2x1xf32, #tpu.memory_space<vmem>>, vector<2x1xf32>
    tpu.vector_store %arg14[%c0_37, %c0_38], %47 {strides = array<i32>} : memref<2x1xf32, #tpu.memory_space<vmem>>, vector<2x1xf32>,
    return
  }
  func.func @transform_0(%arg0: i32) -> (i32, i32) {
    %c0_i32 = arith.constant 0 : i32
    %c0_i32_0 = arith.constant 0 : i32
    return %arg0, %c0_i32 : i32, i32
  }
  func.func @transform_1(%arg0: i32) -> (i32, i32) {
    %c0_i32 = arith.constant 0 : i32
    %c0_i32_0 = arith.constant 0 : i32
    return %arg0, %c0_i32 : i32, i32
  }
  func.func @transform_2(%arg0: i32) -> (i32, i32) {
    %c0_i32 = arith.constant 0 : i32
    %c0_i32_0 = arith.constant 0 : i32
    %c0_i32_1 = arith.constant 0 : i32
    return %c0_i32, %c0_i32_0 : i32, i32
  }
  func.func @transform_3(%arg0: i32) -> (i32, i32) {
    %c0_i32 = arith.constant 0 : i32
    %c0_i32_0 = arith.constant 0 : i32
    %c0_i32_1 = arith.constant 0 : i32
    return %c0_i32, %c0_i32_0 : i32, i32
  }
  func.func @transform_4(%arg0: i32) -> (i32, i32) {
    %c0_i32 = arith.constant 0 : i32
    %c0_i32_0 = arith.constant 0 : i32
    %c0_i32_1 = arith.constant 0 : i32
    return %c0_i32, %c0_i32_0 : i32, i32
  }
  func.func @transform_5(%arg0: i32) -> (i32, i32) {
    %c0_i32 = arith.constant 0 : i32
    %c0_i32_0 = arith.constant 0 : i32
    %c0_i32_1 = arith.constant 0 : i32
    return %c0_i32, %c0_i32_0 : i32, i32
  }
  func.func @transform_6(%arg0: i32) -> (i32, i32) {
    %c0_i32 = arith.constant 0 : i32
    %c0_i32_0 = arith.constant 0 : i32
    %c0_i32_1 = arith.constant 0 : i32
    return %c0_i32, %c0_i32_0 : i32, i32
  }
  func.func @transform_7(%arg0: i32) -> (i32, i32) {
    %c0_i32 = arith.constant 0 : i32
    %c0_i32_0 = arith.constant 0 : i32
    %c0_i32_1 = arith.constant 0 : i32
    return %c0_i32, %c0_i32_0 : i32, i32
  }
  func.func @transform_8(%arg0: i32) -> (i32, i32) {
    %c0_i32 = arith.constant 0 : i32
    %c0_i32_0 = arith.constant 0 : i32
    %c0_i32_1 = arith.constant 0 : i32
    return %c0_i32, %c0_i32_0 : i32, i32
  }
  func.func @transform_9(%arg0: i32) -> (i32, i32) {
    %c0_i32 = arith.constant 0 : i32
    %c0_i32_0 = arith.constant 0 : i32
    %c0_i32_1 = arith.constant 0 : i32
    return %c0_i32, %c0_i32_0 : i32, i32
  }
  func.func @transform_10(%arg0: i32) -> (i32, i32) {
    %c0_i32 = arith.constant 0 : i32
    %c0_i32_0 = arith.constant 0 : i32
    %c0_i32_1 = arith.constant 0 : i32
    return %c0_i32, %c0_i32_0 : i32, i32
  }
  func.func @transform_11(%arg0: i32) -> (i32, i32) {
    %c0_i32 = arith.constant 0 : i32
    %c0_i32_0 = arith.constant 0 : i32
    %c0_i32_1 = arith.constant 0 : i32
    return %c0_i32, %c0_i32_0 : i32, i32
  }
  func.func @transform_12(%arg0: i32) -> (i32, i32) {
    %c0_i32 = arith.constant 0 : i32
    %c0_i32_0 = arith.constant 0 : i32
    return %arg0, %c0_i32 : i32, i32
  }
  func.func @transform_13(%arg0: i32) -> (i32, i32) {
    %c0_i32 = arith.constant 0 : i32
    %c0_i32_0 = arith.constant 0 : i32
    return %arg0, %c0_i32 : i32, i32
  }
}

</mosaic_0001>

<bundles_post_ra>
// kernel: critic_forward.1
= control target key start
LH: loop header
LB: loop body
LE: loop exit
PB: predicated region body
PF: predicated region fallthrough
CT: control target
= control target key end

     0   :  { %s1250_s0 = inlined_call_operand.vmem [shape: f32[2,16], index: 0, kind: input, shape index: {}]   ;;  %s1251_s1 = inlined_call_operand.hbm [shape: f32[2,4], index: 1, kind: input, shape index: {}]   ;;  %s1252_s2 = inlined_call_operand.hbm [shape: bf16[20,512], index: 2, kind: input, shape index: {}]   ;;  %s1253_s3 = inlined_call_operand.vmem [shape: f32[1,512], index: 3, kind: input, shape index: {}]   ;;  %s1254_s4 = inlined_call_operand.hbm [shape: bf16[256,256], index: 4, kind: input, shape index: {}]   ;;  %s1255_s5 = inlined_call_operand.vmem [shape: f32[1,256], index: 5, kind: input, shape index: {}]   ;;  %s1256_s6 = inlined_call_operand.hbm [shape: bf16[256,256], index: 6, kind: input, shape index: {}]   ;;  %s1257_s7 = inlined_call_operand.vmem [shape: f32[1,256], index: 7, kind: input, shape index: {}]   ;;  %s1258_s8 = inlined_call_operand.vmem [shape: f32[1,256], index: 8, kind: input, shape index: {}]   ;;  %s1259_s9 = inlined_call_operand.<no memory space> [shape: f32[1,1], index: 9, kind: input, shape index: {}]   ;;  %s1260_s10 = inlined_call_operand.vmem [shape: f32[1,256], index: 10, kind: input, shape index: {}]   ;;  %s1261_s12 = inlined_call_operand.vmem [shape: f32[2,1], index: 12, kind: output, shape index: {0}]   ;;  %s1262_s13 = inlined_call_operand.vmem [shape: f32[2,1], index: 13, kind: output, shape index: {1}]   ;;  %s1263_s11 = inlined_call_operand.<no memory space> [shape: f32[1,1], index: 11, kind: input, shape index: {}]  }
   0x1   :  { %v19_v0 = vstv %s1259_s9  ;;  %v21_v1 = vstv %s1263_s11 }
   0x2   :  { %20 = vst [vmem:[#allocation3] sm:$0x1] %v19_v0  ;;  %22 = vst [vmem:[#allocation4] sm:$0x1] %v21_v1 }
   0x3   :  { %23 = vsyncpa [#allocation6], 0 }
   0x4   :  { %24 = vsyncpa [#allocation8], 0 }
   0x5   :  { %25 = vsyncpa [#allocation11], 0  ;;  %s1119_s29 = smov [#allocation7]  }
   0x6   :  { %s43_s30 = sshll.u32 %s1119_s29, 4  ;;  %s44_s30 = int_to_ptr.vmem [resolvable:$true] %s43_s30 }
   0x7   :  { %s1041_s14 = scalar_lea.vmem %s44_s30, 768  ;;  %p1046_p1 = scmp.lt.s32.totalorder %s44_s30, %s44_s30 }
   0x8   :  { %p1042_p0 = scmp.ne.s32.totalorder %s44_s30, %s1041_s14  ;;  %p1047_p2 = scmp.lt.s32.totalorder %s1041_s14, %s1041_s14 }
   0xa   :  { %p1048_p3 = por %p1047_p2, %p1046_p1 }
   0xc   :  { %p1049_p4 = pnand %p1048_p3, %p1042_p0 }
   0xe   :  { %1052 = shalt.err (!%p1049_p4)
}
   0xf   :  { %s1120_s9 = smov 256   ;;  %s1121_s15 = smov 16  }
  0x10   :  { %49 = dma.hbm_to_vmem [thread:$0]  %s1252_s2, 768, %s44_s30, [#allocation8], %s1120_s9, %s1120_s9, %s1121_s15  }
  0x11   :  { %s1122_s17 = smov [#allocation5]   ;;  %s1123_s19 = smov [#allocation9]  }
  0x12   :  { %s34_s18 = sshll.u32 %s1122_s17, 4  ;;  %s57_s20 = sshll.u32 %s1123_s19, 4  ;;  %s35_s18 = int_to_ptr.vmem [resolvable:$true] %s34_s18  ;;  %s58_s20 = int_to_ptr.vmem [resolvable:$true] %s57_s20 }
  0x13   :  { %s1061_s21 = scalar_lea.vmem %s35_s18, 32  ;;  %p1066_p6 = scmp.lt.s32.totalorder %s35_s18, %s35_s18 }
  0x14   :  { %p1062_p5 = scmp.ne.s32.totalorder %s35_s18, %s1061_s21  ;;  %p1067_p7 = scmp.lt.s32.totalorder %s1061_s21, %s1061_s21 }
  0x16   :  { %p1068_p8 = por %p1067_p7, %p1066_p6 }
  0x18   :  { %p1069_p9 = pnand %p1068_p8, %p1062_p5 }
  0x1a   :  { %1072 = shalt.err (!%p1069_p9)
}
  0x1b   :  { %37 = dma.hbm_to_vmem [thread:$0]  %s1251_s1, 32, %s35_s18, [#allocation6]  }
  0x1c   :  { %s1081_s24 = scalar_lea.vmem %s58_s20, 4096  ;;  %p1086_p11 = scmp.lt.s32.totalorder %s58_s20, %s58_s20 }
  0x1d   :  { %p1082_p10 = scmp.ne.s32.totalorder %s58_s20, %s1081_s24  ;;  %p1087_p12 = scmp.lt.s32.totalorder %s1081_s24, %s1081_s24 }
  0x1f   :  { %p1088_p13 = por %p1087_p12, %p1086_p11 }
  0x21   :  { %p1089_p0 = pnand %p1088_p13, %p1082_p10 }
  0x23   :  { %1092 = shalt.err (!%p1089_p0)
}
  0x24   :  { %s1124_s2 = smov 128   ;;  %s1125_s25 = smov 8  }
  0x25   :  { %63 = dma.hbm_to_vmem [thread:$0]  %s1254_s4, 4096, %s58_s20, [#allocation8], %s1124_s2, %s1124_s2, %s1125_s25  }
  0x26   :  { %s1126_s28 = smov [#allocation10]  }
  0x27   :  { %s71_s29 = sshll.u32 %s1126_s28, 4  ;;  %s72_s29 = int_to_ptr.vmem [resolvable:$true] %s71_s29 }
  0x28   :  { %s1101_s30 = scalar_lea.vmem %s72_s29, 4096  ;;  %p1106_p2 = scmp.lt.s32.totalorder %s72_s29, %s72_s29 }
  0x29   :  { %p1102_p1 = scmp.ne.s32.totalorder %s72_s29, %s1101_s30  ;;  %p1107_p3 = scmp.lt.s32.totalorder %s1101_s30, %s1101_s30 }
  0x2b   :  { %p1108_p4 = por %p1107_p3, %p1106_p2 }
  0x2d   :  { %p1109_p5 = pnand %p1108_p4, %p1102_p1 }
  0x2f   :  { %1112 = shalt.err (!%p1109_p5)
}
  0x30   :  { %77 = dma.hbm_to_vmem [thread:$0]  %s1256_s6, 4096, %s72_s29, [#allocation11], %s1124_s2, %s1124_s2, %s1125_s25  }
  0x31   :  { %1113 = dma.done.wait [#allocation6], 32  }
  0x32   :  { %1114 = vsyncadd [#allocation6], 4294967264 }
  0x33   :  { %1115 = dma.done.wait [#allocation8], 4864  }
  0x34   :  { %1116 = vsyncadd [#allocation8], 4294962432 }
  0x35   :  { %1117 = dma.done.wait [#allocation11], 4096  }
  0x36   :  { %1118 = vsyncadd [#allocation11], 4294963200  ;;  %v1127_v2 = vmov 0   ;;  %vm102_vm0 = vcmask 123904   ;;  %vm175_vm1 = vcmask 1041408   ;;  %vm109_vm2 = vcmask 156800  }
  0x37   :  { %220 = vmatprep.mubr.bf16.mxu0 %v1127_v2  ;;  %261 = vmatprep.mubr.bf16.mxu1 %v1127_v2  ;;  %v104_v3 = vld [vmem:[#allocation5] sm:$0x3]  ;;  %v101_v4 = vld [vmem:[%s1250_s0] sm:$0x3]  ;;  %v117_v5 = vld [vmem:[#allocation7 + $0x20] sm:$0x33] }
  0x38   :  { %106 = vrot.lane.b32.xlu0 %v104_v3, %s1121_s15  ;;  %103 = vst.msk [vmem:[#allocation2] sm:$0x3] %vm102_vm0, %v101_v4  ;;  %v845_v6 = vcombine.high %v117_v5, %v117_v5  ;;  %v118_v7 = vld [vmem:[#allocation7 + $0x28] sm:$0x33]  ;;  %v844_v8 = vcombine.low %v117_v5, %v117_v5  ;;  %v931_v11 = vld [vmem:[#allocation7 + $0x4] ss:$16 sps:$4 sm:$0xff]  }
  0x39   :  { %v847_v9 = vcombine.high %v118_v7, %v118_v7  ;;  %v846_v10 = vcombine.low %v118_v7, %v118_v7  ;;  %v933_v13 = vld [vmem:[#allocation7 + $0xc] ss:$16 sps:$4 sm:$0xff]   ;;  %v935_v15 = vld [vmem:[#allocation7] ss:$16 sps:$4 sm:$0xff]   ;;  %v936_v16 = vld [vmem:[#allocation7 + $0x8] ss:$16 sps:$4 sm:$0xff]  }
  0x3a   :  { %848 = vmatprep.subr.msk.bf16.mxu0 %vm175_vm1, %v845_v6  ;;  %v177_v12 = vsel %vm175_vm1, %v844_v8, 0  ;;  %v939_v17 = vld [vmem:[#allocation9 + $0x74] ss:$8 sps:$4 sm:$0xff]   ;;  %vm171_vm3 = vcmask 162816   ;;  %v937_v21 = vld [vmem:[#allocation9 + $0x70] ss:$8 sps:$4 sm:$0xff]  }
  0x3b   :  { %850 = vmatprep.subr.msk.bf16.mxu1 %vm175_vm1, %v847_v9  ;;  %201 = vmatpush1.bf16.msra.mxu0 %v177_v12  ;;  %v183_v14 = vsel %vm175_vm1, %v846_v10, 0  ;;  %v942_v18 = vld [vmem:[#allocation10 + $0x74] ss:$8 sps:$4 sm:$0xff]   ;;  %v940_v22 = vld [vmem:[#allocation10 + $0x70] ss:$8 sps:$4 sm:$0xff]   ;;  %vm799_vm4 = vcmask 1024  }
  0x3c   :  { %242 = vmatpush1.bf16.msra.mxu1 %v183_v14  ;;  %202 = vmatprep.subr.bf16.mxu0 %v931_v11  ;;  %v945_v24 = vld [vmem:[#allocation9 + $0x64] ss:$8 sps:$4 sm:$0xff]   ;;  %v943_v26 = vld [vmem:[#allocation9 + $0x60] ss:$8 sps:$4 sm:$0xff]   ;;  %v951_v28 = vld [vmem:[#allocation9 + $0x54] ss:$8 sps:$4 sm:$0xff]  }
  0x3d   :  { %243 = vmatprep.subr.bf16.mxu1 %v933_v13  ;;  %v948_v25 = vld [vmem:[#allocation10 + $0x64] ss:$8 sps:$4 sm:$0xff]   ;;  %v946_v27 = vld [vmem:[#allocation10 + $0x60] ss:$8 sps:$4 sm:$0xff]   ;;  %v954_v29 = vld [vmem:[#allocation10 + $0x54] ss:$8 sps:$4 sm:$0xff]  }
  0x3e   :  { %v949_v30 = vld [vmem:[#allocation9 + $0x50] ss:$8 sps:$4 sm:$0xff]   ;;  %v957_v32 = vld [vmem:[#allocation9 + $0x44] ss:$8 sps:$4 sm:$0xff]   ;;  %v955_v34 = vld [vmem:[#allocation9 + $0x40] ss:$8 sps:$4 sm:$0xff]  }
  0x3f   :  { %203 = vmatpush1.bf16.msra.mxu0 %v935_v15  ;;  %v952_v31 = vld [vmem:[#allocation10 + $0x50] ss:$8 sps:$4 sm:$0xff]   ;;  %v960_v33 = vld [vmem:[#allocation10 + $0x44] ss:$8 sps:$4 sm:$0xff]   ;;  %v958_v35 = vld [vmem:[#allocation10 + $0x40] ss:$8 sps:$4 sm:$0xff]  }
  0x40   :  { %244 = vmatpush1.bf16.msra.mxu1 %v936_v16  ;;  %482 = vmatprep.subr.bf16.mxu0 %v939_v17  ;;  %v963_v36 = vld [vmem:[#allocation9 + $0x34] ss:$8 sps:$4 sm:$0xff]   ;;  %v961_v38 = vld [vmem:[#allocation9 + $0x30] ss:$8 sps:$4 sm:$0xff]   ;;  %v969_v40 = vld [vmem:[#allocation9 + $0x24] ss:$8 sps:$4 sm:$0xff]  }
  0x41   :  { %729 = vmatprep.subr.bf16.mxu1 %v942_v18  ;;  %v966_v37 = vld [vmem:[#allocation10 + $0x34] ss:$8 sps:$4 sm:$0xff]   ;;  %v964_v39 = vld [vmem:[#allocation10 + $0x30] ss:$8 sps:$4 sm:$0xff]   ;;  %v972_v41 = vld [vmem:[#allocation10 + $0x24] ss:$8 sps:$4 sm:$0xff]  }
  0x42   :  { %v967_v42 = vld [vmem:[#allocation9 + $0x20] ss:$8 sps:$4 sm:$0xff]   ;;  %v975_v44 = vld [vmem:[#allocation9 + $0x14] ss:$8 sps:$4 sm:$0xff]   ;;  %v973_v46 = vld [vmem:[#allocation9 + $0x10] ss:$8 sps:$4 sm:$0xff]  }
  0x43   :  { %v970_v43 = vld [vmem:[#allocation10 + $0x20] ss:$8 sps:$4 sm:$0xff]   ;;  %v978_v45 = vld [vmem:[#allocation10 + $0x14] ss:$8 sps:$4 sm:$0xff]   ;;  %v976_v47 = vld [vmem:[#allocation10 + $0x10] ss:$8 sps:$4 sm:$0xff]  }
  0x44   :  { %v981_v48 = vld [vmem:[#allocation9 + $0x4] ss:$8 sps:$4 sm:$0xff]   ;;  %v979_v50 = vld [vmem:[#allocation9] ss:$8 sps:$4 sm:$0xff]   ;;  %v987_v52 = vld [vmem:[#allocation9 + $0xf4] ss:$8 sps:$4 sm:$0xff]  }
  0x45   :  { %v984_v49 = vld [vmem:[#allocation10 + $0x4] ss:$8 sps:$4 sm:$0xff]   ;;  %v982_v51 = vld [vmem:[#allocation10] ss:$8 sps:$4 sm:$0xff]   ;;  %v990_v53 = vld [vmem:[#allocation10 + $0xf4] ss:$8 sps:$4 sm:$0xff]  }
  0x46   :  { %v985_v54 = vld [vmem:[#allocation9 + $0xf0] ss:$8 sps:$4 sm:$0xff]   ;;  %v993_v56 = vld [vmem:[#allocation9 + $0xe4] ss:$8 sps:$4 sm:$0xff]   ;;  %v991_v58 = vld [vmem:[#allocation9 + $0xe0] ss:$8 sps:$4 sm:$0xff]  }
  0x47   :  { %v988_v55 = vld [vmem:[#allocation10 + $0xf0] ss:$8 sps:$4 sm:$0xff]   ;;  %v996_v57 = vld [vmem:[#allocation10 + $0xe4] ss:$8 sps:$4 sm:$0xff]   ;;  %v994_v59 = vld [vmem:[#allocation10 + $0xe0] ss:$8 sps:$4 sm:$0xff]  }
  0x48   :  { %v999_v60 = vld [vmem:[#allocation9 + $0xd4] ss:$8 sps:$4 sm:$0xff]   ;;  %v997_v62 = vld [vmem:[#allocation9 + $0xd0] ss:$8 sps:$4 sm:$0xff]   ;;  %v1005_v0 = vld [vmem:[#allocation9 + $0xc4] ss:$8 sps:$4 sm:$0xff]  }
  0x49   :  { %v1002_v61 = vld [vmem:[#allocation10 + $0xd4] ss:$8 sps:$4 sm:$0xff]   ;;  %v1000_v63 = vld [vmem:[#allocation10 + $0xd0] ss:$8 sps:$4 sm:$0xff]   ;;  %v1008_v1 = vld [vmem:[#allocation10 + $0xc4] ss:$8 sps:$4 sm:$0xff]  }
  0x4a   :  { %v1003_v2 = vld [vmem:[#allocation9 + $0xc0] ss:$8 sps:$4 sm:$0xff]   ;;  %v1011_v4 = vld [vmem:[#allocation9 + $0xb4] ss:$8 sps:$4 sm:$0xff]   ;;  %v1009_v6 = vld [vmem:[#allocation9 + $0xb0] ss:$8 sps:$4 sm:$0xff]  }
  0x4b   :  { %v1006_v3 = vld [vmem:[#allocation10 + $0xc0] ss:$8 sps:$4 sm:$0xff]   ;;  %v1014_v5 = vld [vmem:[#allocation10 + $0xb4] ss:$8 sps:$4 sm:$0xff]   ;;  %v1012_v7 = vld [vmem:[#allocation10 + $0xb0] ss:$8 sps:$4 sm:$0xff]  }
  0x4c   :  { %v1017_v8 = vld [vmem:[#allocation9 + $0xa4] ss:$8 sps:$4 sm:$0xff]   ;;  %v1015_v10 = vld [vmem:[#allocation9 + $0xa0] ss:$8 sps:$4 sm:$0xff]   ;;  %v1023_v12 = vld [vmem:[#allocation9 + $0x94] ss:$8 sps:$4 sm:$0xff]  }
  0x4d   :  { %v1020_v9 = vld [vmem:[#allocation10 + $0xa4] ss:$8 sps:$4 sm:$0xff]   ;;  %v1018_v11 = vld [vmem:[#allocation10 + $0xa0] ss:$8 sps:$4 sm:$0xff]   ;;  %v1026_v13 = vld [vmem:[#allocation10 + $0x94] ss:$8 sps:$4 sm:$0xff]  }
  0x4e   :  { %v1021_v14 = vld [vmem:[#allocation9 + $0x90] ss:$8 sps:$4 sm:$0xff]   ;;  %v1029_v16 = vld [vmem:[#allocation9 + $0x84] ss:$8 sps:$4 sm:$0xff]   ;;  %v1027_v18 = vld [vmem:[#allocation9 + $0x80] ss:$8 sps:$4 sm:$0xff]  }
  0x4f   :  { %v1024_v15 = vld [vmem:[#allocation10 + $0x90] ss:$8 sps:$4 sm:$0xff]   ;;  %v1032_v17 = vld [vmem:[#allocation10 + $0x84] ss:$8 sps:$4 sm:$0xff]  }
  0xaa   :  { %v107_v19 = vpop.permute.xlu0 %106 }
  0xab   :  { %110 = vst.msk [vmem:[#allocation2] sm:$0x3] %vm109_vm2, %v107_v19  ;;  %v1030_v19 = vld [vmem:[#allocation10 + $0x80] ss:$8 sps:$4 sm:$0xff]  }
  0xb2   :  { %v111_v20 = vld [vmem:[#allocation2] sm:$0x3] }
  0xb3   :  { %v112_v23 = vpack.c.bf16 %v111_v20, %v111_v20  ;;  %v121_v20 = vlaneseq }
  0xb5   :  { %849 = vmatmul.mubr.msk.bf16.vlgmr.msra.gmra.mxu0 %vm171_vm3, %v112_v23  ;;  %851 = vmatmul.mubr.msk.bf16.vlgmr.msra.gmra.mxu1 %vm171_vm3, %v112_v23 }
  0xb6   :  { %483 = vmatpush1.bf16.msra.mxu0 %v937_v21  ;;  %730 = vmatpush1.bf16.msra.mxu1 %v940_v22  ;;  %v122_v21 = vshrl.u32 %v121_v20, 7 }
  0xb7   :  { %484 = vmatprep.subr.bf16.mxu0 %v945_v24  ;;  %731 = vmatprep.subr.bf16.mxu1 %v948_v25  ;;  %v119_v24 = vld [vmem:[%s1253_s3] sm:$0xf] }
  0xb8   :  { %v123_v22 = vsub.s32 0, %v122_v21  ;;  %v131_v23 = vsub.s32 2, %v122_v21  ;;  %v127_v25 = vsub.s32 1, %v122_v21 }
  0xba   :  { %485 = vmatpush1.bf16.msra.mxu0 %v943_v26  ;;  %732 = vmatpush1.bf16.msra.mxu1 %v946_v27  ;;  %v135_v26 = vsub.s32 3, %v122_v21  ;;  %v124_v27 = vrot.slane %v119_v24, %v123_v22 }
  0xbb   :  { %486 = vmatprep.subr.bf16.mxu0 %v951_v28  ;;  %733 = vmatprep.subr.bf16.mxu1 %v954_v29  ;;  %v132_v28 = vrot.slane %v119_v24, %v131_v23  ;;  %v128_v29 = vrot.slane %v119_v24, %v127_v25 }
  0xbe   :  { %487 = vmatpush1.bf16.msra.mxu0 %v949_v30  ;;  %734 = vmatpush1.bf16.msra.mxu1 %v952_v31  ;;  %v136_v30 = vrot.slane %v119_v24, %v135_v26  ;;  %v916_v26 = vld [vmem:[#allocation3] ss:$0 sm:$0xff] }
  0xbf   :  { %488 = vmatprep.subr.bf16.mxu0 %v957_v32  ;;  %735 = vmatprep.subr.bf16.mxu1 %v960_v33 }
  0xc2   :  { %489 = vmatpush1.bf16.msra.mxu0 %v955_v34  ;;  %736 = vmatpush1.bf16.msra.mxu1 %v958_v35 }
  0xc3   :  { %490 = vmatprep.subr.bf16.mxu0 %v963_v36  ;;  %737 = vmatprep.subr.bf16.mxu1 %v966_v37 }
  0xc6   :  { %491 = vmatpush1.bf16.msra.mxu0 %v961_v38  ;;  %738 = vmatpush1.bf16.msra.mxu1 %v964_v39 }
  0xc7   :  { %492 = vmatprep.subr.bf16.mxu0 %v969_v40  ;;  %739 = vmatprep.subr.bf16.mxu1 %v972_v41 }
  0xca   :  { %493 = vmatpush1.bf16.msra.mxu0 %v967_v42  ;;  %740 = vmatpush1.bf16.msra.mxu1 %v970_v43 }
  0xcb   :  { %494 = vmatprep.subr.bf16.mxu0 %v975_v44  ;;  %741 = vmatprep.subr.bf16.mxu1 %v978_v45 }
  0xce   :  { %495 = vmatpush1.bf16.msra.mxu0 %v973_v46  ;;  %742 = vmatpush1.bf16.msra.mxu1 %v976_v47 }
  0xcf   :  { %496 = vmatprep.subr.bf16.mxu0 %v981_v48  ;;  %743 = vmatprep.subr.bf16.mxu1 %v984_v49 }
  0xd2   :  { %497 = vmatpush1.bf16.msra.mxu0 %v979_v50  ;;  %744 = vmatpush1.bf16.msra.mxu1 %v982_v51  ;;  %v310_v51 = vld [vmem:[%s1255_s5] sm:$0x3] }
  0xd3   :  { %498 = vmatprep.subr.bf16.mxu0 %v987_v52  ;;  %745 = vmatprep.subr.bf16.mxu1 %v990_v53  ;;  %v557_v52 = vld [vmem:[%s1257_s7] sm:$0x3]  ;;  %v315_v53 = vrot.slane %v310_v51, %v123_v22 }
  0xd6   :  { %499 = vmatpush2.bf16.msra.mxu0 %v985_v54  ;;  %746 = vmatpush2.bf16.msra.mxu1 %v988_v55  ;;  %v562_v54 = vrot.slane %v557_v52, %v123_v22  ;;  %v772_v55 = vld [vmem:[%s1258_s8] sm:$0x3] }
  0xd7   :  { %500 = vmatprep.subr.bf16.mxu0 %v993_v56  ;;  %747 = vmatprep.subr.bf16.mxu1 %v996_v57  ;;  %v801_v56 = vld [vmem:[%s1260_s10] sm:$0x3]  ;;  %v319_v57 = vrot.slane %v310_v51, %v127_v25 }
  0xda   :  { %501 = vmatpush2.bf16.msra.mxu0 %v991_v58  ;;  %748 = vmatpush2.bf16.msra.mxu1 %v994_v59  ;;  %v566_v58 = vrot.slane %v557_v52, %v127_v25 }
  0xdb   :  { %502 = vmatprep.subr.bf16.mxu0 %v999_v60  ;;  %749 = vmatprep.subr.bf16.mxu1 %v1002_v61 }
  0xde   :  { %503 = vmatpush2.bf16.msra.mxu0 %v997_v62  ;;  %750 = vmatpush2.bf16.msra.mxu1 %v1000_v63  ;;  %v777_v62 = vrot.slane %v772_v55, %v123_v22 }
  0xdf   :  { %504 = vmatprep.subr.bf16.mxu0 %v1005_v0  ;;  %751 = vmatprep.subr.bf16.mxu1 %v1008_v1  ;;  %v806_v0 = vrot.slane %v801_v56, %v123_v22 }
  0xe2   :  { %505 = vmatpush2.bf16.msra.mxu0 %v1003_v2  ;;  %752 = vmatpush2.bf16.msra.mxu1 %v1006_v3  ;;  %v781_v2 = vrot.slane %v772_v55, %v127_v25 }
  0xe3   :  { %506 = vmatprep.subr.bf16.mxu0 %v1011_v4  ;;  %753 = vmatprep.subr.bf16.mxu1 %v1014_v5  ;;  %v810_v4 = vrot.slane %v801_v56, %v127_v25  ;;  %v917_v25 = vld [vmem:[#allocation4] ss:$0 sm:$0xff] }
  0xe6   :  { %507 = vmatpush2.bf16.msra.mxu0 %v1009_v6  ;;  %754 = vmatpush2.bf16.msra.mxu1 %v1012_v7 }
  0xe7   :  { %508 = vmatprep.subr.bf16.mxu0 %v1017_v8  ;;  %755 = vmatprep.subr.bf16.mxu1 %v1020_v9 }
  0xea   :  { %509 = vmatpush2.bf16.msra.mxu0 %v1015_v10  ;;  %756 = vmatpush2.bf16.msra.mxu1 %v1018_v11 }
  0xeb   :  { %510 = vmatprep.subr.bf16.mxu0 %v1023_v12  ;;  %757 = vmatprep.subr.bf16.mxu1 %v1026_v13 }
  0xee   :  { %511 = vmatpush2.bf16.msra.mxu0 %v1021_v14  ;;  %758 = vmatpush2.bf16.msra.mxu1 %v1024_v15 }
  0xef   :  { %512 = vmatprep.subr.bf16.mxu0 %v1029_v16  ;;  %759 = vmatprep.subr.bf16.mxu1 %v1032_v17 }
  0xf2   :  { %513 = vmatpush2.bf16.msra.mxu0 %v1027_v18  ;;  %760 = vmatpush2.bf16.msra.mxu1 %v1030_v19 }
 0x175   :  { %v222_v31 = vpop.f32.mrf.mxu0  ;;  %v263_v32 = vpop.f32.mrf.mxu1 }
 0x176   :  { %v223_v33 = vadd.f32 %v222_v31, %v124_v27  ;;  %v264_v34 = vadd.f32 %v263_v32, %v132_v28 }
 0x177   :  { %v224_v35 = vpop.f32.mrf.mxu0  ;;  %v265_v36 = vpop.f32.mrf.mxu1 }
 0x178   :  { %v225_v37 = vadd.f32 %v224_v35, %v128_v29  ;;  %v266_v38 = vadd.f32 %v265_v36, %v136_v30  ;;  %v270_v39 = vmax.f32 %v223_v33, 0.0  ;;  %v272_v40 = vmax.f32 %v264_v34, 0.0 }
 0x179   :  { %v226_v41 = vpop.f32.mrf.mxu0  ;;  %v267_v42 = vpop.f32.mrf.mxu1 }
 0x17a   :  { %v271_v43 = vmax.f32 %v225_v37, 0.0  ;;  %v273_v44 = vmax.f32 %v266_v38, 0.0  ;;  %v274_v49 = vpack.c.bf16 %v270_v39, %v270_v39  ;;  %v276_v50 = vpack.c.bf16 %v272_v40, %v272_v40 }
 0x17b   :  { %v227_v45 = vpop.f32.mrf.mxu0  ;;  %v268_v46 = vpop.f32.mrf.mxu1 }
 0x17c   :  { %v275_v47 = vpack.c.bf16 %v271_v43, %v271_v43  ;;  %v277_v48 = vpack.c.bf16 %v273_v44, %v273_v44 }
 0x17e   :  { %514 = vmatprep.mubr.bf16.mxu0 %v275_v47  ;;  %761 = vmatprep.mubr.bf16.mxu1 %v277_v48 }
 0x17f   :  { %515 = vmatmul.mubr.bf16.vlgmr.msra.gmra.mxu0 %v274_v49  ;;  %762 = vmatmul.mubr.bf16.vlgmr.msra.gmra.mxu1 %v276_v50 }
 0x23f   :  { %v516_v59 = vpop.f32.mrf.mxu0  ;;  %v763_v60 = vpop.f32.mrf.mxu1 }
 0x240   :  { %v517_v61 = vadd.f32 %v516_v59, %v315_v53  ;;  %v764_v63 = vadd.f32 %v763_v60, %v562_v54 }
 0x241   :  { %v518_v1 = vpop.f32.mrf.mxu0  ;;  %v765_v3 = vpop.f32.mrf.mxu1 }
 0x242   :  { %v523_v5 = vmax.f32 %v517_v61, 0.0  ;;  %v770_v6 = vmax.f32 %v764_v63, 0.0  ;;  %v519_v7 = vadd.f32 %v518_v1, %v319_v57  ;;  %v766_v8 = vadd.f32 %v765_v3, %v566_v58 }
 0x243   :  { %v520_v9 = vpop.f32.mrf.mxu0  ;;  %v767_v10 = vpop.f32.mrf.mxu1 }
 0x244   :  { %v784_v11 = vmul.f32 %v777_v62, %v523_v5  ;;  %v524_v12 = vmax.f32 %v519_v7, 0.0  ;;  %v771_v13 = vmax.f32 %v766_v8, 0.0  ;;  %v813_v14 = vmul.f32 %v806_v0, %v770_v6 }
 0x245   :  { %v521_v15 = vpop.f32.mrf.mxu0  ;;  %v768_v16 = vpop.f32.mrf.mxu1 }
 0x246   :  { %v785_v17 = vmul.f32 %v781_v2, %v524_v12  ;;  %v814_v18 = vmul.f32 %v810_v4, %v771_v13  ;;  %v815_v19 = vsel %vm175_vm1, %v813_v14, 0.0  ;;  %v786_v21 = vsel %vm175_vm1, %v784_v11, 0.0 }
 0x248   :  { %v816_v20 = vsel %vm175_vm1, %v814_v18, 0.0  ;;  %v787_v22 = vsel %vm175_vm1, %v785_v17, 0.0 }
 0x249   :  { %v817_v23 = vadd.f32 %v816_v20, %v815_v19  ;;  %v788_v24 = vadd.f32 %v787_v22, %v786_v21 }
 0x24b   :  { %818 = vadd.xlane.f32.xlu1 %v817_v23  ;;  %789 = vadd.xlane.f32.xlu0 %v788_v24 }
 0x2d4   :  { %v819_v27 = vpop.xlane.xlu1 %818  ;;  %v790_v28 = vpop.xlane.xlu0 %789 }
 0x2d5   :  { %v827_v29 = vadd.f32 %v917_v25, %v819_v27  ;;  %v798_v30 = vadd.f32 %v916_v26, %v790_v28 }
 0x2d7   :  { %828 = vst.msk [vmem:[%s1262_s13] sm:$0x3] %vm799_vm4, %v827_v29  ;;  %800 = vst.msk [vmem:[%s1261_s12] sm:$0x3] %vm799_vm4, %v798_v30 }
 0x2d8   :  { %837 = vsyncpa [#allocation6], 1 }
 0x2d9   :  { %838 = vsyncpa [#allocation8], 1 }
 0x2da   :  { %839 = vsyncpa [#allocation11], 1 }

</bundles_post_ra>
